<compile_context>
chip_gen: v5e
topology: v5e:2x2
jax: 0.10.0
libtpu: 0.0.40
codegen_flags: <defaults>
</compile_context>

<pallas_src>
import jax
import jax.numpy as jnp
from jax import lax
from jax.experimental import pallas as pl
from jax.experimental.pallas import tpu as pltpu


def attn_kernel(xa_ref, params_ref, o_ref):
    # xa:     (N1+N2, D+1) = [x1 | 1 ; x2 | 1]
    # params: (D+1, 3D)    = [[Wq^T | Wk^T | Wv^T] ; [bq | bk | bv]]
    xa = xa_ref[...]
    params = params_ref[...]

    n1 = o_ref.shape[0]
    d = o_ref.shape[1]

    # Single fused projection matmul (one MXU round-trip, bias included).
    proj = jnp.dot(xa, params, preferred_element_type=jnp.float32)  # (N1+N2, 3D)

    q = proj[:n1, :d]             # x1 rows, Q columns
    k = proj[n1:, d:2 * d]        # x2 rows, K columns
    v = proj[n1:, 2 * d:3 * d]    # x2 rows, V columns

    # s = q @ k^T : contract the feature axis of both (no transpose materialized).
    s = lax.dot_general(q, k, (((1,), (1,)), ((), ())),
                        preferred_element_type=jnp.float32)          # (N1, N2)

    # Numerically-stable softmax; 1/sum folded after the PV matmul (exact).
    m = jnp.max(s, axis=-1, keepdims=True)
    e = jnp.exp(s - m)
    l = jnp.sum(e, axis=-1, keepdims=True)                           # (N1, 1)
    ev = jnp.dot(e, v, preferred_element_type=jnp.float32)           # (N1, D)
    o_ref[...] = ev * pl.reciprocal(l, approx=False)


def attention(x1, x2, wq, bq, wk, bk, wv, bv):
    n1, d = x1.shape
    n2 = x2.shape[0]

    # --- host-side packing: 8 tensors -> 2 kernel inputs -------------------
    ones1 = jnp.ones((n1, 1), dtype=x1.dtype)
    ones2 = jnp.ones((n2, 1), dtype=x2.dtype)
    xa = jnp.concatenate(
        [jnp.concatenate([x1, ones1], axis=1),
         jnp.concatenate([x2, ones2], axis=1)], axis=0)              # (N1+N2, D+1)

    w_packed = jnp.concatenate([wq.T, wk.T, wv.T], axis=1)           # (D, 3D)
    b_packed = jnp.concatenate([bq, bk, bv])[None, :]                # (1, 3D)
    params = jnp.concatenate([w_packed, b_packed], axis=0)           # (D+1, 3D)

    vmem = pl.BlockSpec(memory_space=pltpu.MemorySpace.VMEM)
    return pl.pallas_call(
        attn_kernel,
        out_shape=jax.ShapeDtypeStruct((n1, d), jnp.float32),
        in_specs=[vmem, vmem],
        out_specs=vmem,
    )(xa, params)


def reference(x1, x2, wq, bq, wk, bk, wv, bv):
    q = x1 @ wq.T + bq
    k = x2 @ wk.T + bk
    v = x2 @ wv.T + bv
    s = q @ k.T
    p = jax.nn.softmax(s, axis=-1)
    return p @ v


if __name__ == "__main__":
    key = jax.random.PRNGKey(0)
    k_x1, k_x2, k_wq, k_bq, k_wk, k_bk, k_wv, k_bv = jax.random.split(key, 8)

    D = 4
    x1 = jax.random.normal(k_x1, (2, D), dtype=jnp.float32)
    x2 = jax.random.normal(k_x2, (2, D), dtype=jnp.float32)

    # Deterministic nn.Linear(4, 4)-shaped parameters (uniform like PyTorch init).
    bound = 1.0 / (D ** 0.5)
    wq = jax.random.uniform(k_wq, (D, D), minval=-bound, maxval=bound)
    bq = jax.random.uniform(k_bq, (D,), minval=-bound, maxval=bound)
    wk = jax.random.uniform(k_wk, (D, D), minval=-bound, maxval=bound)
    bk = jax.random.uniform(k_bk, (D,), minval=-bound, maxval=bound)
    wv = jax.random.uniform(k_wv, (D, D), minval=-bound, maxval=bound)
    bv = jax.random.uniform(k_bv, (D,), minval=-bound, maxval=bound)

    out = attention(x1, x2, wq, bq, wk, bk, wv, bv)
    jax.block_until_ready(out)

    ref = reference(x1, x2, wq, bq, wk, bk, wv, bv)
    assert out.shape == (2, D)
    assert jnp.allclose(out, ref, atol=1e-5, rtol=1e-5), (out, ref)

    print("KERNEL_OK")
</pallas_src>

<mosaic_0001>
module attributes {stable_mosaic.version = 11 : i64} {
  func.func @attn_kernel(%arg0: memref<4x5xf32, #tpu.memory_space<vmem>>, %arg1: memref<5x12xf32, #tpu.memory_space<vmem>>, %arg2: memref<2x4xf32, #tpu.memory_space<vmem>>) attributes {dimension_semantics = [], scalar_prefetch = 0 : i64, scratch_operands = 0 : i64, tpu.core_type = #tpu.core_type<tc>} {
    %c0 = arith.constant 0 : index
    %c0_0 = arith.constant 0 : index
    %0 = vector.load %arg0[%c0, %c0_0] : memref<4x5xf32, #tpu.memory_space<vmem>>, vector<4x5xf32>
    %c0_1 = arith.constant 0 : index
    %c0_2 = arith.constant 0 : index
    %1 = vector.load %arg1[%c0_1, %c0_2] : memref<5x12xf32, #tpu.memory_space<vmem>>, vector<5x12xf32>
    %cst = arith.constant dense<0.000000e+00> : vector<4x12xf32>
    %2 = tpu.matmul %0, %1, %cst {dimension_numbers = #tpu.dot_dimension_numbers<[1], [0], [0], [1], [0, 0, 1, 1], [], []>} : vector<4x5xf32>, vector<5x12xf32>, vector<4x12xf32> -> vector<4x12xf32>
    %3 = vector.extract_strided_slice %2 {offsets = [0, 0], sizes = [2, 4], strides = [1, 1]} : vector<4x12xf32> to vector<2x4xf32>
    %4 = vector.extract_strided_slice %2 {offsets = [2, 4], sizes = [2, 4], strides = [1, 1]} : vector<4x12xf32> to vector<2x4xf32>
    %5 = vector.extract_strided_slice %2 {offsets = [2, 8], sizes = [2, 4], strides = [1, 1]} : vector<4x12xf32> to vector<2x4xf32>
    %cst_3 = arith.constant dense<0.000000e+00> : vector<2x2xf32>
    %6 = tpu.matmul %3, %4, %cst_3 {dimension_numbers = #tpu.dot_dimension_numbers<[1], [1], [0], [0], [0, 0, 1, 0], [], []>} : vector<2x4xf32>, vector<2x4xf32>, vector<2x2xf32> -> vector<2x2xf32>
    %cst_4 = arith.constant dense<0xFF800000> : vector<2xf32>
    %7 = vector.multi_reduction <maximumf>, %6, %cst_4 [1] : vector<2x2xf32> to vector<2xf32>
    %8 = vector.shape_cast %7 : vector<2xf32> to vector<2x1xf32>
    %9 = vector.broadcast %8 : vector<2x1xf32> to vector<2x2xf32>
    %10 = arith.subf %6, %9 : vector<2x2xf32>
    %11 = math.exp %10 : vector<2x2xf32>
    %cst_5 = arith.constant dense<0.000000e+00> : vector<2xf32>
    %12 = vector.multi_reduction <add>, %11, %cst_5 [1] : vector<2x2xf32> to vector<2xf32>
    %13 = vector.shape_cast %12 : vector<2xf32> to vector<2x1xf32>
    %cst_6 = arith.constant dense<0.000000e+00> : vector<2x4xf32>
    %14 = tpu.matmul %11, %5, %cst_6 {dimension_numbers = #tpu.dot_dimension_numbers<[1], [0], [0], [1], [0, 0, 1, 1], [], []>} : vector<2x2xf32>, vector<2x4xf32>, vector<2x4xf32> -> vector<2x4xf32>
    %15 = tpu.reciprocal %13 : vector<2x1xf32> -> vector<2x1xf32>
    %16 = vector.broadcast %15 : vector<2x1xf32> to vector<2x4xf32>
    %17 = arith.mulf %14, %16 : vector<2x4xf32>
    %c0_7 = arith.constant 0 : index
    %c0_8 = arith.constant 0 : index
    %18 = vector.load %arg2[%c0_7, %c0_8] : memref<2x4xf32, #tpu.memory_space<vmem>>, vector<2x4xf32>
    tpu.vector_store %arg2[%c0_7, %c0_8], %17 {strides = array<i32>} : memref<2x4xf32, #tpu.memory_space<vmem>>, vector<2x4xf32>,
    return
  }
}

</mosaic_0001>

<bundles_post_ra>
// kernel: tpu_custom_call.1
= control target key start
LH: loop header
LB: loop body
LE: loop exit
PB: predicated region body
PF: predicated region fallthrough
CT: control target
= control target key end

     0   :  { %7 = vsyncpa [#allocation3], 0  ;;  %s295_s0 = inlined_call_operand.hbm [shape: f32[4,5], index: 0, kind: input, shape index: {}]   ;;  %s296_s1 = inlined_call_operand.hbm [shape: f32[5,12], index: 1, kind: input, shape index: {}]   ;;  %s297_s2 = inlined_call_operand.hbm [shape: f32[2,4], index: 2, kind: output, shape index: {}]  }
   0x1   :  { %8 = vsyncpa [#allocation6], 0 }
   0x2   :  { %9 = vsyncpa [#allocation4], 0  ;;  %s15_s11 = sshll.u32 %s295_s0, 4  ;;  %s266_s12 = smov [#allocation2]   ;;  %s16_s11 = int_to_ptr.hbm [resolvable:$true] %s15_s11 }
   0x3   :  { %s17_s13 = sshll.u32 %s266_s12, 4  ;;  %s26_s16 = sshll.u32 %s296_s1, 4  ;;  %s18_s13 = int_to_ptr.vmem [resolvable:$true] %s17_s13  ;;  %s27_s16 = int_to_ptr.hbm [resolvable:$true] %s26_s16 }
   0x4   :  { %20 = dma.hbm_to_vmem [thread:$0]  %s16_s11, 64, %s18_s13, [#allocation3]  }
   0x5   :  { %s267_s17 = smov [#allocation5]  }
   0x6   :  { %s28_s18 = sshll.u32 %s267_s17, 4  ;;  %s29_s18 = int_to_ptr.vmem [resolvable:$true] %s28_s18 }
   0x7   :  { %31 = dma.hbm_to_vmem [thread:$0]  %s27_s16, 128, %s29_s18, [#allocation6]  }
   0x8   :  { %260 = dma.done.wait [#allocation3], 64  }
   0x9   :  { %261 = vsyncadd [#allocation3], 4294967232 }
   0xa   :  { %262 = dma.done.wait [#allocation6], 128  }
   0xb   :  { %263 = vsyncadd [#allocation6], 4294967168  ;;  %vm46_vm0 = vcmask 1044480   ;;  %vm42_vm1 = vcmask 39936   ;;  %v41_v0 = vld [vmem:[#allocation5] sm:$0x1f] }
   0xc   :  { %v40_v1 = vld [vmem:[#allocation2] sm:$0xf]  ;;  %173 = vmatpush.msk.msra.mxu0 %vm46_vm0, %v41_v0  ;;  %s268_s0 = smov 120   ;;  %s269_s1 = smov 124   ;;  %vm74_vm2 = vcmask 31744   ;;  %vm115_vm3 = vcmask 1041408  }
   0xd   :  { %174 = vmatmul.msk.f32.vlgmr.msra.gmra.mxu0 %vm42_vm1, %v40_v1  ;;  %vm99_vm4 = vcmask 9216   ;;  %vm111_vm5 = vcmask 15360   ;;  %s270_s19 = smov [#allocation7]   ;;  %s162_s23 = sshll.u32 %s297_s2, 4  ;;  %vm153_vm10 = vcmask 25600   ;;  %s163_s23 = int_to_ptr.hbm [resolvable:$true] %s162_s23 }
   0xe   :  { %s160_s20 = sshll.u32 %s270_s19, 4  ;;  %s161_s20 = int_to_ptr.vmem [resolvable:$true] %s160_s20 }
  0x8a   :  { %v67_v2 = vpop.f32.mrf.mxu0 }
  0x8b   :  { %v71_v3 = vrot.slane %v67_v2, 2 }
  0x8d   :  { %109 = vrot.lane.b32.xlu1 %v71_v3, %s268_s0  ;;  %72 = vrot.lane.b32.xlu0 %v71_v3, %s269_s1 }
  0xff   :  { %v110_v4 = vpop.permute.xlu1 %109  ;;  %v73_v5 = vpop.permute.xlu0 %72 }
 0x100   :  { %175 = vmatpush.xpose.msk.msra.mxu1 %vm74_vm2, %v73_v5  ;;  %177 = vmatpush.msk.msra.mxu2 %vm115_vm3, %v110_v4 }
 0x103   :  { %176 = vmatmul.msk.f32.vlgmr.msra.gmra.mxu1 %vm74_vm2, %v67_v2 }
 0x180   :  { %v96_v6 = vpop.f32.mrf.mxu1 }
 0x181   :  { %v100_v7 = vsel %vm99_vm4, %v96_v6, -inf }
 0x182   :  { %101 = vmax.xlane.f32.xlu0 %v100_v7 }
 0x1f5   :  { %v102_v8 = vpop.xlane.xlu0 %101 }
 0x1f6   :  { %v103_v9 = vsub.f32 %v96_v6, %v102_v8 }
 0x1f8   :  { %v104_v10 = vmul.f32 1.442695, %v103_v9 }
 0x1fa   :  { %184 = vpow2.f32 %v104_v10 }
 0x200   :  { %v185_v11 = vpop.eup %184 }
 0x201   :  { %178 = vmatmul.msk.f32.vlgmr.msra.gmra.mxu2 %vm111_vm5, %v185_v11  ;;  %v106_v12 = vsel %vm99_vm4, %v185_v11, 0.0 }
 0x202   :  { %107 = vadd.xlane.f32.xlu1 %v106_v12 }
 0x275   :  { %v108_v13 = vpop.xlane.xlu1 %107 }
 0x276   :  { %186 = vrcp.f32 %v108_v13  ;;  %v149_v17 = vand.u32 2147483648, %v108_v13  ;;  %v147_v19 = vand.u32 2147483647, %v108_v13  ;;  %vm143_vm7 = vweird.f32 %v108_v13 }
 0x278   :  { %v150_v21 = vor.u32 1.1754944e-38, %v149_v17  ;;  %vm148_vm9 = vcmp.eq.f32.partialorder %v147_v19, 8.507059e+37 }
 0x27c   :  { %v187_v14 = vpop.eup %186 }
 0x27d   :  { %v139_v15 = vmul.f32 %v187_v14, %v108_v13  ;;  %vm144_vm6 = vweird.f32 %v187_v14 }
 0x27e   :  { %vm145_vm8 = vmor %vm143_vm7, %vm144_vm6 }
 0x27f   :  { %v140_v16 = vsub.f32 1.0, %v139_v15 }
 0x281   :  { %v141_v18 = vmul.f32 %v187_v14, %v140_v16 }
 0x283   :  { %v142_v20 = vadd.f32 %v187_v14, %v141_v18 }
 0x284   :  { %v135_v23 = vpop.f32.mrf.mxu2 }
 0x285   :  { %v146_v22 = vsel %vm145_vm8, %v187_v14, %v142_v20 }
 0x286   :  { %v151_v24 = vsel %vm148_vm9, %v150_v21, %v146_v22 }
 0x287   :  { %v152_v25 = vmul.f32 %v151_v24, %v135_v23 }
 0x289   :  { %154 = vst.msk [vmem:[#allocation7] sm:$0x3] %vm153_vm10, %v152_v25 }
 0x28a   :  { %165 = dma.vmem_to_hbm [thread:$0]  %s161_s20, 32, %s163_s23, [#allocation4]  }
 0x28b   :  { %264 = dma.done.wait [#allocation4], 32  }
 0x28c   :  { %265 = vsyncadd [#allocation4], 4294967264 }
 0x28d   :  { %170 = vsyncpa [#allocation3], 1 }
 0x28e   :  { %171 = vsyncpa [#allocation6], 1 }
 0x28f   :  { %172 = vsyncpa [#allocation4], 1 }

</bundles_post_ra>
